<compile_context>
chip_gen: v6e
topology: v6e:2x2x1
jax: 0.10.0
libtpu: 0.0.40
codegen_flags: <defaults>
</compile_context>

<pallas_src>
import jax
import jax.numpy as jnp
from jax.experimental import pallas as pl
from jax.experimental.pallas import tpu as pltpu

ENT_DIM = 8            # entity-embedding width
GRAPH_DIM = 8          # graph-embedding width
H1 = 32                # per-head hidden-1 width
H2 = 16                # per-head hidden-2 width
HEAD_OUT = (5, 5, 2)   # ship / asteroid / mineral output widths
OUT_OFF = (0, 5, 10)   # disjoint output-lane offsets per head
LANES = 128            # lane-dense width of all packed weights and the output

# Packed weight-slab row layout (every row is LANES wide, unused lanes are 0):
_W1E_ROW = 0                       # rows [0, 8)    : entity half of L1 weights (lanes 0:96)
_W1G_ROW = _W1E_ROW + ENT_DIM      # rows [8, 16)   : graph  half of L1 weights (lanes 0:96)
_B1_ROW = _W1G_ROW + GRAPH_DIM     # row 16         : L1 bias (lanes 0:96)
_B2_ROW = _B1_ROW + 1              # row 17         : L2 bias (lanes 0:48)
_B3_ROW = _B2_ROW + 1              # row 18         : L3 bias (lanes 0:12)
_W2_ROW = 24                       # rows [24, 152) : block-diag L2 weights [128,128]
_W3_ROW = _W2_ROW + LANES          # rows [152, 280): block-diag L3 weights [128,128]
_SLAB_ROWS = _W3_ROW + LANES       # 280


def _decoder_kernel(x_ref, g_ref, w_ref, o_ref):
    """Fused 3-head decoder MLP: 4 MXU matmuls, one full-tile store.

    For a row x of head h (lane blocks disjoint per head by construction):
      out = relu(relu(concat(x, graph) @ W1_h + b1_h) @ W2_h + b2_h) @ W3_h + b3_h
    """
    w1e = w_ref[pl.ds(_W1E_ROW, ENT_DIM), :]      # [8, 128]
    w1g = w_ref[pl.ds(_W1G_ROW, GRAPH_DIM), :]    # [8, 128]
    b1 = w_ref[pl.ds(_B1_ROW, 1), :]              # [1, 128]
    b2 = w_ref[pl.ds(_B2_ROW, 1), :]              # [1, 128]
    b3 = w_ref[pl.ds(_B3_ROW, 1), :]              # [1, 128]
    w2 = w_ref[pl.ds(_W2_ROW, LANES), :]          # [128, 128] block-diagonal
    w3 = w_ref[pl.ds(_W3_ROW, LANES), :]          # [128, 128] block-diagonal

    # Graph contribution computed once, shared by every row of every head.
    g_row = jnp.dot(g_ref[...], w1g, preferred_element_type=jnp.float32) + b1   # [1, 128]

    h1 = jnp.maximum(
        jnp.dot(x_ref[...], w1e, preferred_element_type=jnp.float32) + g_row, 0.0)
    h2 = jnp.maximum(
        jnp.dot(h1, w2, preferred_element_type=jnp.float32) + b2, 0.0)
    # Single lane-dense, full-tile (rows multiple of 8 x 128 lanes) store.
    o_ref[...] = jnp.dot(h2, w3, preferred_element_type=jnp.float32) + b3


@jax.jit
def decoder_forward(w_slab, ship_embed, asteroids_embed, minerals_embed, graph_embed):
    """Single fused Pallas launch for all three decoder heads."""
    n_s = ship_embed.shape[0]
    n_a = asteroids_embed.shape[0]
    n_m = minerals_embed.shape[0]
    n_total = n_s + n_a + n_m
    n_pad = (-n_total) % 8

    parts = [ship_embed, asteroids_embed, minerals_embed]
    if n_pad:
        parts.append(jnp.zeros((n_pad, ENT_DIM), jnp.float32))
    x = jnp.concatenate(parts, axis=0)            # [n_rows, 8]
    n_rows = x.shape[0]

    flops = 2 * (GRAPH_DIM * LANES            # graph row
                 + n_rows * ENT_DIM * LANES   # L1
                 + 2 * n_rows * LANES * LANES)  # L2 + L3
    bytes_accessed = 4 * (x.size + graph_embed.size + w_slab.size + n_rows * LANES)

    vmem = pl.BlockSpec(memory_space=pltpu.MemorySpace.VMEM)
    out = pl.pallas_call(
        _decoder_kernel,
        out_shape=jax.ShapeDtypeStruct((n_rows, LANES), jnp.float32),
        in_specs=[vmem, vmem, vmem],
        out_specs=vmem,
        cost_estimate=pl.CostEstimate(flops=flops, transcendentals=0,
                                      bytes_accessed=bytes_accessed),
    )(x, graph_embed, w_slab)

    # Cheap static row/lane slices back to the three heads (disjoint ranges).
    ship = out[0:n_s, OUT_OFF[0]:OUT_OFF[0] + HEAD_OUT[0]]
    ast = out[n_s:n_s + n_a, OUT_OFF[1]:OUT_OFF[1] + HEAD_OUT[1]]
    mins = out[n_s + n_a:n_total, OUT_OFF[2]:OUT_OFF[2] + HEAD_OUT[2]]
    return ship, ast, mins


def init_mlp_params(key, dims):
    """Deterministic init for Linear layers with dims like (16, 32, 16, 5).

    Returns (w1, b1, w2, b2, w3, b3); weights are [in, out], biases [1, out]
    (PyTorch Linear convention x @ W^T + b, weights stored pre-transposed).
    """
    params = []
    for i in range(len(dims) - 1):
        fan_in, fan_out = dims[i], dims[i + 1]
        key, kw, kb = jax.random.split(key, 3)
        bound = 1.0 / jnp.sqrt(fan_in)
        w = jax.random.uniform(kw, (fan_in, fan_out), jnp.float32, -bound, bound)
        b = jax.random.uniform(kb, (1, fan_out), jnp.float32, -bound, bound)
        params.extend([w, b])
    return tuple(params)


def fuse_head_params(per_head_params):
    """One-time (init) packing of all per-head params into one [280,128] slab.

    Layer-1 weights of the 3 heads are stacked along lanes (32 lanes each);
    layer-2/3 weights are block-diagonal with disjoint per-head lane blocks;
    layer-3 maps to disjoint output lanes (0:5 / 5:10 / 10:12); all unused
    lanes/rows are exact zeros so padded lanes stay exactly zero.
    """
    slab = jnp.zeros((_SLAB_ROWS, LANES), jnp.float32)
    for h, (w1, b1, w2, b2, w3, b3) in enumerate(per_head_params):
        c1 = h * H1
        c2 = h * H2
        c3 = OUT_OFF[h]
        no = HEAD_OUT[h]
        slab = slab.at[_W1E_ROW:_W1E_ROW + ENT_DIM, c1:c1 + H1].set(w1[:ENT_DIM])
        slab = slab.at[_W1G_ROW:_W1G_ROW + GRAPH_DIM, c1:c1 + H1].set(w1[ENT_DIM:])
        slab = slab.at[_B1_ROW, c1:c1 + H1].set(b1[0])
        slab = slab.at[_W2_ROW + c1:_W2_ROW + c1 + H1, c2:c2 + H2].set(w2)
        slab = slab.at[_B2_ROW, c2:c2 + H2].set(b2[0])
        slab = slab.at[_W3_ROW + c2:_W3_ROW + c2 + H2, c3:c3 + no].set(w3)
        slab = slab.at[_B3_ROW, c3:c3 + no].set(b3[0])
    return slab


class DecoderPallas:
    """Pallas port of the PyTorch Decoder module (single fused kernel)."""

    def __init__(self, key):
        k1, k2, k3 = jax.random.split(key, 3)
        self.ship_params = init_mlp_params(k1, (16, H1, H2, HEAD_OUT[0]))
        self.asteroid_params = init_mlp_params(k2, (16, H1, H2, HEAD_OUT[1]))
        self.mineral_params = init_mlp_params(k3, (16, H1, H2, HEAD_OUT[2]))
        self.w_slab = fuse_head_params(
            [self.ship_params, self.asteroid_params, self.mineral_params])

    def __call__(self, ship_embed, asteroids_embed, minerals_embed, graph_embed):
        return decoder_forward(self.w_slab, ship_embed, asteroids_embed,
                               minerals_embed, graph_embed)


def _mlp3_ref(x, params):
    w1, b1, w2, b2, w3, b3 = params
    h = jnp.maximum(x @ w1 + b1, 0.0)
    h = jnp.maximum(h @ w2 + b2, 0.0)
    return h @ w3 + b3


if __name__ == "__main__":
    key = jax.random.PRNGKey(0)
    k_param, k_ship, k_ast, k_min, k_graph = jax.random.split(key, 5)

    decoder = DecoderPallas(k_param)

    # Small deterministic inputs: 8-dim embeddings (8 + 8 -> 16 after concat).
    ship_embed = jax.random.normal(k_ship, (1, ENT_DIM), jnp.float32)
    asteroids_embed = jax.random.normal(k_ast, (8, ENT_DIM), jnp.float32)
    minerals_embed = jax.random.normal(k_min, (4, ENT_DIM), jnp.float32)
    graph_embed = jax.random.normal(k_graph, (1, GRAPH_DIM), jnp.float32)

    ship_data, asteroids_data, minerals_data = decoder(
        ship_embed, asteroids_embed, minerals_embed, graph_embed
    )
    jax.block_until_ready((ship_data, asteroids_data, minerals_data))

    # Pure-JAX reference check (matches the PyTorch forward exactly).
    ship_ref = _mlp3_ref(
        jnp.concatenate((ship_embed, graph_embed), axis=1), decoder.ship_params
    )
    ast_ref = _mlp3_ref(
        jnp.concatenate(
            (asteroids_embed, jnp.repeat(graph_embed, asteroids_embed.shape[0], 0)),
            axis=1,
        ),
        decoder.asteroid_params,
    )
    min_ref = _mlp3_ref(
        jnp.concatenate(
            (minerals_embed, jnp.repeat(graph_embed, minerals_embed.shape[0], 0)),
            axis=1,
        ),
        decoder.mineral_params,
    )

    assert ship_data.shape == (1, HEAD_OUT[0])
    assert asteroids_data.shape == (8, HEAD_OUT[1])
    assert minerals_data.shape == (4, HEAD_OUT[2])
    assert jnp.allclose(ship_data, ship_ref, atol=1e-5)
    assert jnp.allclose(asteroids_data, ast_ref, atol=1e-5)
    assert jnp.allclose(minerals_data, min_ref, atol=1e-5)

    print("KERNEL_OK")
</pallas_src>

<mosaic_0001>
module attributes {stable_mosaic.version = 11 : i64} {
  func.func @_decoder_kernel(%arg0: memref<16x8xf32, #tpu.memory_space<vmem>>, %arg1: memref<1x8xf32, #tpu.memory_space<vmem>>, %arg2: memref<280x128xf32, #tpu.memory_space<vmem>>, %arg3: memref<16x128xf32, #tpu.memory_space<vmem>>) attributes {dimension_semantics = [], scalar_prefetch = 0 : i64, scratch_operands = 0 : i64, tpu.core_type = #tpu.core_type<tc>} {
    %c0 = arith.constant 0 : index
    %c0_0 = arith.constant 0 : index
    %0 = vector.load %arg2[%c0, %c0_0] : memref<280x128xf32, #tpu.memory_space<vmem>>, vector<8x128xf32>
    %c8 = arith.constant 8 : index
    %c0_1 = arith.constant 0 : index
    %1 = vector.load %arg2[%c8, %c0_1] : memref<280x128xf32, #tpu.memory_space<vmem>>, vector<8x128xf32>
    %c16 = arith.constant 16 : index
    %c0_2 = arith.constant 0 : index
    %2 = vector.load %arg2[%c16, %c0_2] : memref<280x128xf32, #tpu.memory_space<vmem>>, vector<1x128xf32>
    %c17 = arith.constant 17 : index
    %c0_3 = arith.constant 0 : index
    %3 = vector.load %arg2[%c17, %c0_3] : memref<280x128xf32, #tpu.memory_space<vmem>>, vector<1x128xf32>
    %c18 = arith.constant 18 : index
    %c0_4 = arith.constant 0 : index
    %4 = vector.load %arg2[%c18, %c0_4] : memref<280x128xf32, #tpu.memory_space<vmem>>, vector<1x128xf32>
    %c24 = arith.constant 24 : index
    %c0_5 = arith.constant 0 : index
    %5 = vector.load %arg2[%c24, %c0_5] : memref<280x128xf32, #tpu.memory_space<vmem>>, vector<128x128xf32>
    %c152 = arith.constant 152 : index
    %c0_6 = arith.constant 0 : index
    %6 = vector.load %arg2[%c152, %c0_6] : memref<280x128xf32, #tpu.memory_space<vmem>>, vector<128x128xf32>
    %c0_7 = arith.constant 0 : index
    %c0_8 = arith.constant 0 : index
    %7 = vector.load %arg1[%c0_7, %c0_8] : memref<1x8xf32, #tpu.memory_space<vmem>>, vector<1x8xf32>
    %cst = arith.constant dense<0.000000e+00> : vector<1x128xf32>
    %8 = tpu.matmul %7, %1, %cst {dimension_numbers = #tpu.dot_dimension_numbers<[1], [0], [0], [1], [0, 0, 1, 1], [], []>} : vector<1x8xf32>, vector<8x128xf32>, vector<1x128xf32> -> vector<1x128xf32>
    %9 = arith.addf %8, %2 : vector<1x128xf32>
    %c0_9 = arith.constant 0 : index
    %c0_10 = arith.constant 0 : index
    %10 = vector.load %arg0[%c0_9, %c0_10] : memref<16x8xf32, #tpu.memory_space<vmem>>, vector<16x8xf32>
    %cst_11 = arith.constant dense<0.000000e+00> : vector<16x128xf32>
    %11 = tpu.matmul %10, %0, %cst_11 {dimension_numbers = #tpu.dot_dimension_numbers<[1], [0], [0], [1], [0, 0, 1, 1], [], []>} : vector<16x8xf32>, vector<8x128xf32>, vector<16x128xf32> -> vector<16x128xf32>
    %12 = vector.broadcast %9 : vector<1x128xf32> to vector<16x128xf32>
    %13 = arith.addf %11, %12 : vector<16x128xf32>
    %cst_12 = arith.constant 0.000000e+00 : f32
    %14 = vector.broadcast %cst_12 : f32 to vector<16x128xf32>
    %15 = arith.maximumf %13, %14 : vector<16x128xf32>
    %cst_13 = arith.constant dense<0.000000e+00> : vector<16x128xf32>
    %16 = tpu.matmul %15, %5, %cst_13 {dimension_numbers = #tpu.dot_dimension_numbers<[1], [0], [0], [1], [0, 0, 1, 1], [], []>} : vector<16x128xf32>, vector<128x128xf32>, vector<16x128xf32> -> vector<16x128xf32>
    %17 = vector.broadcast %3 : vector<1x128xf32> to vector<16x128xf32>
    %18 = arith.addf %16, %17 : vector<16x128xf32>
    %cst_14 = arith.constant 0.000000e+00 : f32
    %19 = vector.broadcast %cst_14 : f32 to vector<16x128xf32>
    %20 = arith.maximumf %18, %19 : vector<16x128xf32>
    %cst_15 = arith.constant dense<0.000000e+00> : vector<16x128xf32>
    %21 = tpu.matmul %20, %6, %cst_15 {dimension_numbers = #tpu.dot_dimension_numbers<[1], [0], [0], [1], [0, 0, 1, 1], [], []>} : vector<16x128xf32>, vector<128x128xf32>, vector<16x128xf32> -> vector<16x128xf32>
    %22 = vector.broadcast %4 : vector<1x128xf32> to vector<16x128xf32>
    %23 = arith.addf %21, %22 : vector<16x128xf32>
    %c0_16 = arith.constant 0 : index
    %c0_17 = arith.constant 0 : index
    %24 = vector.load %arg3[%c0_16, %c0_17] : memref<16x128xf32, #tpu.memory_space<vmem>>, vector<16x128xf32>
    tpu.vector_store %arg3[%c0_16, %c0_17], %23 {strides = array<i32>} : memref<16x128xf32, #tpu.memory_space<vmem>>, vector<16x128xf32>,
    return
  }
}

</mosaic_0001>

<bundles_post_ra>
// kernel: decoder_forward.1
= control target key start
LH: loop header
LB: loop body
LE: loop exit
PB: predicated region body
PF: predicated region fallthrough
CT: control target
= control target key end

     0   :  { %8 = vsyncpa [#allocation3], 0  ;;  %s549_s12 = smov [#allocation2]   ;;  %s592_s0 = inlined_call_operand.vmem [shape: f32[16,8], index: 0, kind: input, shape index: {}]   ;;  %s593_s1 = inlined_call_operand.vmem [shape: f32[1,8], index: 1, kind: input, shape index: {}]   ;;  %s594_s2 = inlined_call_operand.hbm [shape: f32[280,128], index: 2, kind: input, shape index: {}]   ;;  %s595_s3 = inlined_call_operand.vmem [shape: f32[16,128], index: 3, kind: output, shape index: {}]  }
   0x1   :  { %s18_s13 = sshll.u32 %s549_s12, 4  ;;  %s19_s13 = int_to_ptr.vmem [resolvable:$true] %s18_s13 }
   0x2   :  { %s535_s14 = scalar_lea.vmem %s19_s13, 4480  ;;  %p540_p1 = scmp.lt.s32.totalorder %s19_s13, %s19_s13 }
   0x3   :  { %p536_p0 = scmp.ne.s32.totalorder %s19_s13, %s535_s14  ;;  %p541_p2 = scmp.lt.s32.totalorder %s535_s14, %s535_s14 }
   0x5   :  { %p542_p3 = por %p541_p2, %p540_p1 }
   0x7   :  { %p543_p4 = pnand %p542_p3, %p536_p0 }
   0x9   :  { %546 = shalt.err (!%p543_p4)
}
   0xa   :  { %s550_s15 = smov 128   ;;  %s551_s16 = smov 8  }
   0xb   :  { %24 = dma.hbm_to_vmem [thread:$0]  %s594_s2, 4480, %s19_s13, [#allocation3], %s550_s15, %s550_s15, %s551_s16  }
   0xc   :  { %547 = dma.done.wait [#allocation3], 4480  }
   0xd   :  { %548 = vsyncadd [#allocation3], 4294962816  ;;  %v552_v0 = vmov 0.0   ;;  %vm553_vm0 = vmmov 0   ;;  %vm66_vm1 = vcmask 64512   ;;  %v29_v1 = vld [vmem:[#allocation2 + $0x8] sm:$0xff]  ;;  %v142_v34 = vlaneseq }
   0xe   :  { %442 = vmatprep.subr.mxu0 %v552_v0  ;;  %444 = vmatprep.mubr.msk.f32.mxu0 %vm553_vm0, %v552_v0  ;;  %v28_v2 = vld [vmem:[#allocation2] sm:$0xff]  ;;  %v141_v5 = vld [vmem:[%s592_s0 + $0x8] sm:$0xff]  ;;  %v48_v6 = vld [vmem:[#allocation2 + $0x90] sm:$0xff] }
   0xf   :  { %v65_v3 = vld [vmem:[%s593_s1] sm:$0x1]  ;;  %443 = vmatpush3.msra.mxu0 %v29_v1  ;;  %447 = vmatprep.subr.mxu1 %v28_v2  ;;  %v47_v7 = vld [vmem:[#allocation2 + $0x88] sm:$0xff]  ;;  %v45_v9 = vld [vmem:[#allocation2 + $0x78] sm:$0xff]  ;;  %v143_v35 = vshrl.u32 %v142_v34, 7 }
  0x10   :  { %v140_v4 = vld [vmem:[%s592_s0] sm:$0xff]  ;;  %445 = vmatmul.mubr.msk.f32.vlgmr.msra.gmra.mxu0 %vm66_vm1, %v65_v3  ;;  %448 = vmatpush3.msra.mxu1 %v28_v2  ;;  %v44_v10 = vld [vmem:[#allocation2 + $0x70] sm:$0xff]  ;;  %v43_v11 = vld [vmem:[#allocation2 + $0x68] sm:$0xff] }
  0x11   :  { %449 = vmatprep.mubr.msk.f32.mxu1 %vm66_vm1, %v140_v4  ;;  %452 = vmatprep.subr.mxu0 %v48_v6  ;;  %v46_v8 = vld [vmem:[#allocation2 + $0x80] sm:$0xff]  ;;  %v41_v13 = vld [vmem:[#allocation2 + $0x58] sm:$0xff]  ;;  %v40_v14 = vld [vmem:[#allocation2 + $0x50] sm:$0xff]  ;;  %v144_v37 = vsub.s32 0, %v143_v35 }
  0x12   :  { %450 = vmatmul.mubr.msk.f32.vlgmr.msra.gmra.mxu1 %vm66_vm1, %v141_v5  ;;  %453 = vmatpush3.msra.mxu0 %v48_v6  ;;  %v42_v12 = vld [vmem:[#allocation2 + $0x60] sm:$0xff]  ;;  %v39_v15 = vld [vmem:[#allocation2 + $0x48] sm:$0xff]  ;;  %v37_v17 = vld [vmem:[#allocation2 + $0x38] sm:$0xff] }
  0x13   :  { %454 = vmatprep.subr.mxu0 %v47_v7  ;;  %v38_v16 = vld [vmem:[#allocation2 + $0x40] sm:$0xff]  ;;  %v36_v18 = vld [vmem:[#allocation2 + $0x30] sm:$0xff]  ;;  %v35_v19 = vld [vmem:[#allocation2 + $0x28] sm:$0xff] }
  0x14   :  { %455 = vmatpush3.msra.mxu0 %v47_v7  ;;  %v34_v20 = vld [vmem:[#allocation2 + $0x20] sm:$0xff]  ;;  %v33_v21 = vld [vmem:[#allocation2 + $0x18] sm:$0xff]  ;;  %v64_v22 = vld [vmem:[#allocation2 + $0x110] sm:$0xff] }
  0x15   :  { %456 = vmatprep.subr.mxu0 %v46_v8  ;;  %v63_v23 = vld [vmem:[#allocation2 + $0x108] sm:$0xff]  ;;  %487 = vmatprep.subr.mxu1 %v64_v22  ;;  %v62_v24 = vld [vmem:[#allocation2 + $0x100] sm:$0xff]  ;;  %v61_v25 = vld [vmem:[#allocation2 + $0xf8] sm:$0xff] }
  0x16   :  { %457 = vmatpush3.msra.mxu0 %v46_v8  ;;  %488 = vmatpush3.msra.mxu1 %v64_v22  ;;  %v60_v26 = vld [vmem:[#allocation2 + $0xf0] sm:$0xff]  ;;  %v59_v27 = vld [vmem:[#allocation2 + $0xe8] sm:$0xff]  ;;  %v58_v28 = vld [vmem:[#allocation2 + $0xe0] sm:$0xff] }
  0x17   :  { %458 = vmatprep.subr.mxu0 %v45_v9  ;;  %489 = vmatprep.subr.mxu1 %v63_v23  ;;  %v57_v29 = vld [vmem:[#allocation2 + $0xd8] sm:$0xff]  ;;  %v56_v30 = vld [vmem:[#allocation2 + $0xd0] sm:$0xff]  ;;  %v55_v31 = vld [vmem:[#allocation2 + $0xc8] sm:$0xff] }
  0x18   :  { %459 = vmatpush3.msra.mxu0 %v45_v9  ;;  %490 = vmatpush3.msra.mxu1 %v63_v23  ;;  %v54_v32 = vld [vmem:[#allocation2 + $0xc0] sm:$0xff]  ;;  %v53_v33 = vld [vmem:[#allocation2 + $0xb8] sm:$0xff]  ;;  %v30_v36 = vld [vmem:[#allocation2 + $0x10] sm:$0x1] }
  0x19   :  { %460 = vmatprep.subr.mxu0 %v44_v10  ;;  %491 = vmatprep.subr.mxu1 %v62_v24  ;;  %v52_v48 = vld [vmem:[#allocation2 + $0xb0] sm:$0xff]  ;;  %v51_v49 = vld [vmem:[#allocation2 + $0xa8] sm:$0xff]  ;;  %v50_v50 = vld [vmem:[#allocation2 + $0xa0] sm:$0xff] }
  0x1a   :  { %461 = vmatpush3.msra.mxu0 %v44_v10  ;;  %492 = vmatpush3.msra.mxu1 %v62_v24  ;;  %v49_v51 = vld [vmem:[#allocation2 + $0x98] sm:$0xff]  ;;  %v399_v52 = vld [vmem:[#allocation2 + $0x11] ss:$0 sm:$0xff]  ;;  %v400_v59 = vld [vmem:[#allocation2 + $0x12] ss:$0 sm:$0xff] }
  0x1b   :  { %462 = vmatprep.subr.mxu0 %v43_v11  ;;  %493 = vmatprep.subr.mxu1 %v61_v25 }
  0x1c   :  { %463 = vmatpush3.msra.mxu0 %v43_v11  ;;  %494 = vmatpush3.msra.mxu1 %v61_v25 }
  0x1d   :  { %464 = vmatprep.subr.mxu0 %v42_v12  ;;  %495 = vmatprep.subr.mxu1 %v60_v26 }
  0x1e   :  { %465 = vmatpush3.msra.mxu0 %v42_v12  ;;  %496 = vmatpush3.msra.mxu1 %v60_v26 }
  0x1f   :  { %466 = vmatprep.subr.mxu0 %v41_v13  ;;  %497 = vmatprep.subr.mxu1 %v59_v27 }
  0x20   :  { %467 = vmatpush3.msra.mxu0 %v41_v13  ;;  %498 = vmatpush3.msra.mxu1 %v59_v27 }
  0x21   :  { %468 = vmatprep.subr.mxu0 %v40_v14  ;;  %499 = vmatprep.subr.mxu1 %v58_v28 }
  0x22   :  { %469 = vmatpush3.msra.mxu0 %v40_v14  ;;  %500 = vmatpush3.msra.mxu1 %v58_v28 }
  0x23   :  { %470 = vmatprep.subr.mxu0 %v39_v15  ;;  %501 = vmatprep.subr.mxu1 %v57_v29 }
  0x24   :  { %471 = vmatpush3.msra.mxu0 %v39_v15  ;;  %502 = vmatpush3.msra.mxu1 %v57_v29 }
  0x25   :  { %472 = vmatprep.subr.mxu0 %v38_v16  ;;  %503 = vmatprep.subr.mxu1 %v56_v30 }
  0x26   :  { %473 = vmatpush3.msra.mxu0 %v38_v16  ;;  %504 = vmatpush3.msra.mxu1 %v56_v30 }
  0x27   :  { %474 = vmatprep.subr.mxu0 %v37_v17  ;;  %505 = vmatprep.subr.mxu1 %v55_v31 }
  0x28   :  { %475 = vmatpush3.msra.mxu0 %v37_v17  ;;  %506 = vmatpush3.msra.mxu1 %v55_v31 }
  0x29   :  { %476 = vmatprep.subr.mxu0 %v36_v18  ;;  %507 = vmatprep.subr.mxu1 %v54_v32 }
  0x2a   :  { %477 = vmatpush3.msra.mxu0 %v36_v18  ;;  %508 = vmatpush3.msra.mxu1 %v54_v32 }
  0x2b   :  { %478 = vmatprep.subr.mxu0 %v35_v19  ;;  %509 = vmatprep.subr.mxu1 %v53_v33 }
  0x2c   :  { %479 = vmatpush3.msra.mxu0 %v35_v19  ;;  %510 = vmatpush3.msra.mxu1 %v53_v33 }
  0x2d   :  { %480 = vmatprep.subr.mxu0 %v34_v20  ;;  %511 = vmatprep.subr.mxu1 %v52_v48 }
  0x2e   :  { %481 = vmatpush3.msra.mxu0 %v34_v20  ;;  %512 = vmatpush3.msra.mxu1 %v52_v48 }
  0x2f   :  { %482 = vmatprep.subr.mxu0 %v33_v21  ;;  %513 = vmatprep.subr.mxu1 %v51_v49 }
  0x30   :  { %483 = vmatpush3.msra.mxu0 %v33_v21  ;;  %514 = vmatpush3.msra.mxu1 %v51_v49 }
  0x31   :  { %515 = vmatprep.subr.mxu1 %v50_v50 }
  0x32   :  { %516 = vmatpush3.msra.mxu1 %v50_v50 }
  0x33   :  { %517 = vmatprep.subr.mxu1 %v49_v51 }
  0x34   :  { %518 = vmatpush3.msra.mxu1 %v49_v51 }
  0xd0   :  { %v136_v38 = vpop.f32.mrf.mxu0 }
  0xd1   :  { %v137_v39 = vadd.f32 %v136_v38, %v30_v36 }
  0xd2   :  { %v451_v40 = vpop.f32.mrf.mxu1  ;;  %v446_v41 = vpop.f32.mrf.mxu0 }
  0xd3   :  { %v145_v42 = vrot.slane %v137_v39, %v144_v37 }
  0xd4   :  { %v218_v43 = vpop.f32.mrf.mxu1 }
  0xd5   :  { %v224_v44 = vadd.f32 %v451_v40, %v145_v42  ;;  %v219_v45 = vadd.f32 %v218_v43, %v145_v42 }
  0xd7   :  { %v228_v46 = vmax.f32 %v224_v44, 0.0  ;;  %v227_v47 = vmax.f32 %v219_v45, 0.0 }
  0xd9   :  { %484 = vmatprep.mubr.f32.mxu0 %v227_v47 }
  0xda   :  { %485 = vmatmul.mubr.f32.vlgmr.msra.gmra.mxu0 %v228_v46 }
 0x19a   :  { %v486_v53 = vpop.f32.mrf.mxu0 }
 0x19b   :  { %v305_v54 = vadd.f32 %v486_v53, %v399_v52 }
 0x19c   :  { %v299_v55 = vpop.f32.mrf.mxu0 }
 0x19d   :  { %v300_v56 = vadd.f32 %v399_v52, %v299_v55  ;;  %v309_v58 = vmax.f32 %v305_v54, 0.0 }
 0x19f   :  { %v308_v57 = vmax.f32 %v300_v56, 0.0 }
 0x1a1   :  { %519 = vmatprep.mubr.f32.mxu1 %v308_v57 }
 0x1a2   :  { %520 = vmatmul.mubr.f32.vlgmr.msra.gmra.mxu1 %v309_v58 }
 0x262   :  { %v521_v60 = vpop.f32.mrf.mxu1 }
 0x263   :  { %v386_v61 = vadd.f32 %v521_v60, %v400_v59 }
 0x264   :  { %v380_v62 = vpop.f32.mrf.mxu1 }
 0x265   :  { %390 = vst [vmem:[%s595_s3 + $0x8] sm:$0xff] %v386_v61  ;;  %v381_v63 = vadd.f32 %v400_v59, %v380_v62 }
 0x267   :  { %389 = vst [vmem:[%s595_s3] sm:$0xff] %v381_v63 }
 0x268   :  { %395 = vsyncpa [#allocation3], 1 }

</bundles_post_ra>
